<compile_context>
chip_gen: v6e
topology: v6e:2x2x1
jax: 0.10.0
libtpu: 0.0.40
codegen_flags: <defaults>
</compile_context>

<pallas_src>
import functools
import math

import jax
import jax.numpy as jnp
from jax.experimental import pallas as pl
from jax.experimental.pallas import tpu as pltpu

_VPU_MAX_N = 8  # above this, use the MXU kernel


def _linear_vpu_kernel(h_ref, w_ref, b_ref, o_ref):
    # h_ref: (TILE_M, K) f32 VMEM
    # w_ref: (N, K)      f32 VMEM  -- PyTorch layout, no transpose needed
    # b_ref: (N,)        f32 SMEM  -- bias as scalars
    # o_ref: (TILE_M, N) f32 VMEM  -- N tiny (== 1 for BaselineNetwork)
    h = h_ref[...]
    w = w_ref[...]
    n_out = o_ref.shape[-1]
    cols = []
    for n in range(n_out):  # static unroll; n_out == 1 here
        # VPU multiply (sublane-broadcast weight row) + XLU lane reduce.
        acc = jnp.sum(h * w[n:n + 1, :], axis=-1, keepdims=True)  # (TILE_M, 1)
        cols.append(acc + b_ref[n])                               # scalar bias (SMEM)
    out = cols[0] if n_out == 1 else jnp.concatenate(cols, axis=-1)
    o_ref[...] = out.astype(o_ref.dtype)


def _linear_mxu_kernel(h_ref, wt_ref, b_ref, o_ref):
    # h_ref:  (TILE_M, K) f32 VMEM
    # wt_ref: (K, N)      f32 VMEM  -- weight pre-transposed once, outside kernel
    # b_ref:  (1, N)      f32 VMEM
    # o_ref:  (TILE_M, N) f32 VMEM
    acc = jnp.dot(h_ref[...], wt_ref[...], preferred_element_type=jnp.float32)
    o_ref[...] = (acc + b_ref[...]).astype(o_ref.dtype)


def _default_tile_m():
    """Per-generation row tile (input buffer ~2-4 MiB after lane padding)."""
    try:
        kind = jax.devices()[0].device_kind.lower()
    except Exception:
        kind = ""
    if "v6" in kind or "v7" in kind:
        return 8192   # 32 MiB scoped VMEM, higher HBM BW -> bigger tile
    return 4096       # safe for v5e's 16 MiB scoped VMEM with double buffering


def _round_up(x, m):
    return (x + m - 1) // m * m


@functools.partial(jax.jit, static_argnames=("tile_m",))
def _baseline_pallas(h2, weight, bias, tile_m):
    m, k = h2.shape
    n_out = weight.shape[0]
    grid_m = m // tile_m  # m is already padded to a multiple of tile_m

    if n_out <= _VPU_MAX_N:
        kernel = _linear_vpu_kernel
        w_arg = weight                       # (N, K)
        b_arg = bias                         # (N,) -> SMEM scalars
        w_spec = pl.BlockSpec((n_out, k), lambda i: (0, 0))
        b_spec = pl.BlockSpec(memory_space=pltpu.MemorySpace.SMEM)
    else:
        kernel = _linear_mxu_kernel
        w_arg = weight.T                     # (K, N), transposed once under jit
        b_arg = bias.reshape(1, n_out)       # (1, N) VMEM
        w_spec = pl.BlockSpec((k, n_out), lambda i: (0, 0))
        b_spec = pl.BlockSpec((1, n_out), lambda i: (0, 0))

    return pl.pallas_call(
        kernel,
        out_shape=jax.ShapeDtypeStruct((m, n_out), h2.dtype),
        grid=(grid_m,),
        in_specs=[
            pl.BlockSpec((tile_m, k), lambda i: (i, 0)),   # h rows, streamed
            w_spec,                                        # weight (resident)
            b_spec,                                        # bias
        ],
        out_specs=pl.BlockSpec((tile_m, n_out), lambda i: (i, 0)),
        compiler_params=pltpu.CompilerParams(
            dimension_semantics=("parallel",),             # shards M across v7x's 2 TCs
        ),
    )(h2, w_arg, b_arg)


def baseline_network_pallas(h, weight, bias, *, tile_m=None):
    """b = h @ weight.T + bias  (nn.Linear forward; .detach() is grad-only).

    Args:
        h:      (..., input_size) f32. Leading dims (T, B, ...) are flattened so a
                whole trajectory runs through one tiled, pipelined pallas_call.
        weight: (output_size, input_size) f32 -- PyTorch layout.
        bias:   (output_size,) f32.
    Returns:
        (..., output_size) f32.
    """
    *lead, k = h.shape
    n_out, k_w = weight.shape
    assert k == k_w, "input_size mismatch between h and weight"
    m = math.prod(lead) if lead else 1
    h2 = h.reshape(m, k)

    if tile_m is None:
        tile_m = _default_tile_m()
    tile = min(int(tile_m), _round_up(m, 8))
    tile = max(8, _round_up(tile, 8))        # sublane constraint on (TILE_M, ...)
    m_pad = _round_up(m, tile)
    if m_pad != m:
        h2 = jnp.pad(h2, ((0, m_pad - m), (0, 0)))

    out = _baseline_pallas(h2, weight, bias, tile)
    if m_pad != m:
        out = out[:m]
    return out.reshape(*lead, n_out)


def baseline_network(h, weight, bias, *, min_pallas_rows=2048):
    """Dispatcher: tiny batches fall back to plain XLA (per perf review), since a
    standalone kernel at M~B is pure launch overhead and blocks XLA fusion."""
    *lead, _ = h.shape
    m = math.prod(lead) if lead else 1
    if m < min_pallas_rows:
        return h @ weight.T + bias
    return baseline_network_pallas(h, weight, bias)


if __name__ == "__main__":
    key = jax.random.PRNGKey(0)
    k_h, k_w, k_b, k_w2, k_b2 = jax.random.split(key, 5)

    # Small shapes implied by the forward: h_t is (B, input_size), b_t is (B, 1).
    T, B, input_size, output_size = 10, 8, 32, 1
    bound = 1.0 / math.sqrt(input_size)   # nn.Linear's U(-1/sqrt(in), 1/sqrt(in))
    weight = jax.random.uniform(
        k_w, (output_size, input_size), jnp.float32, -bound, bound)
    bias = jax.random.uniform(k_b, (output_size,), jnp.float32, -bound, bound)
    h_seq = jax.random.normal(k_h, (T, B, input_size), jnp.float32)
    ref_seq = h_seq @ weight.T + bias

    # 1) Pallas path with a deliberately small tile to exercise the M-grid
    #    (3 tiles + a padded edge tile) at small test shapes.
    b_seq = jax.block_until_ready(
        baseline_network_pallas(h_seq, weight, bias, tile_m=32))
    assert b_seq.shape == (T, B, output_size)
    assert jnp.allclose(b_seq, ref_seq, atol=1e-5, rtol=1e-5)

    # 2) Single-timestep call (the module's per-step forward signature), Pallas path.
    b_t = jax.block_until_ready(baseline_network_pallas(h_seq[0], weight, bias))
    assert b_t.shape == (B, output_size)
    assert jnp.allclose(b_t, ref_seq[0], atol=1e-5, rtol=1e-5)

    # 3) Dispatcher: tiny M falls back to plain XLA (recommended for shipped shapes).
    b_x = jax.block_until_ready(baseline_network(h_seq[0], weight, bias))
    assert jnp.allclose(b_x, ref_seq[0], atol=1e-5, rtol=1e-5)

    # 4) MXU path for a wider head (output_size > 8), previously untested.
    n_wide = 16
    weight_w = jax.random.uniform(
        k_w2, (n_wide, input_size), jnp.float32, -bound, bound)
    bias_w = jax.random.uniform(k_b2, (n_wide,), jnp.float32, -bound, bound)
    b_wide = jax.block_until_ready(
        baseline_network_pallas(h_seq, weight_w, bias_w))
    assert b_wide.shape == (T, B, n_wide)
    assert jnp.allclose(b_wide, h_seq @ weight_w.T + bias_w, atol=1e-5, rtol=1e-5)

    print("KERNEL_OK")
</pallas_src>

<mosaic_0001>
module attributes {stable_mosaic.version = 11 : i64} {
  func.func @_linear_vpu_kernel(%arg0: i32, %arg1: memref<32x32xf32, #tpu.memory_space<vmem>>, %arg2: memref<1x32xf32, #tpu.memory_space<vmem>>, %arg3: memref<1xf32, #tpu.memory_space<smem>>, %arg4: memref<32x1xf32, #tpu.memory_space<vmem>>) attributes {dimension_semantics = [#tpu.dimension_semantics<parallel>], iteration_bounds = array<i64: 3>, scalar_prefetch = 0 : i64, scratch_operands = 0 : i64, tpu.core_type = #tpu.core_type<tc>, window_params = [{transform_indices = @transform_0, window_bounds = array<i64: 32, 32>}, {pipeline_mode = #tpu.pipeline_mode<synchronous>, transform_indices = @transform_1, window_bounds = array<i64: 1, 32>}, {transform_indices = @transform_2, window_bounds = array<i64: 1>}, {transform_indices = @transform_3, window_bounds = array<i64: 32, 1>}]} {
    %c0 = arith.constant 0 : index
    %c0_0 = arith.constant 0 : index
    %0 = vector.load %arg1[%c0, %c0_0] : memref<32x32xf32, #tpu.memory_space<vmem>>, vector<32x32xf32>
    %c0_1 = arith.constant 0 : index
    %c0_2 = arith.constant 0 : index
    %1 = vector.load %arg2[%c0_1, %c0_2] : memref<1x32xf32, #tpu.memory_space<vmem>>, vector<1x32xf32>
    %2 = vector.broadcast %1 : vector<1x32xf32> to vector<32x32xf32>
    %3 = arith.mulf %0, %2 : vector<32x32xf32>
    %cst = arith.constant dense<0.000000e+00> : vector<32xf32>
    %4 = vector.multi_reduction <add>, %3, %cst [1] : vector<32x32xf32> to vector<32xf32>
    %5 = vector.shape_cast %4 : vector<32xf32> to vector<32x1xf32>
    %c0_3 = arith.constant 0 : index
    %6 = memref.load %arg3[%c0_3] : memref<1xf32, #tpu.memory_space<smem>>
    %7 = vector.broadcast %6 : f32 to vector<32x1xf32>
    %8 = arith.addf %5, %7 : vector<32x1xf32>
    %c0_4 = arith.constant 0 : index
    %c0_5 = arith.constant 0 : index
    %9 = vector.load %arg4[%c0_4, %c0_5] : memref<32x1xf32, #tpu.memory_space<vmem>>, vector<32x1xf32>
    tpu.vector_store %arg4[%c0_4, %c0_5], %8 {strides = array<i32>} : memref<32x1xf32, #tpu.memory_space<vmem>>, vector<32x1xf32>,
    return
  }
  func.func @transform_0(%arg0: i32) -> (i32, i32) {
    %c0_i32 = arith.constant 0 : i32
    %c0_i32_0 = arith.constant 0 : i32
    return %arg0, %c0_i32 : i32, i32
  }
  func.func @transform_1(%arg0: i32) -> (i32, i32) {
    %c0_i32 = arith.constant 0 : i32
    %c0_i32_0 = arith.constant 0 : i32
    %c0_i32_1 = arith.constant 0 : i32
    return %c0_i32, %c0_i32_0 : i32, i32
  }
  func.func @transform_2(%arg0: i32) -> i32 {
    %c0_i32 = arith.constant 0 : i32
    %c0_i32_0 = arith.constant 0 : i32
    return %c0_i32 : i32
  }
  func.func @transform_3(%arg0: i32) -> (i32, i32) {
    %c0_i32 = arith.constant 0 : i32
    %c0_i32_0 = arith.constant 0 : i32
    return %arg0, %c0_i32 : i32, i32
  }
}

</mosaic_0001>

<bundles_post_ra>
// kernel: _baseline_pallas.1
= control target key start
LH: loop header
LB: loop body
LE: loop exit
PB: predicated region body
PF: predicated region fallthrough
CT: control target
= control target key end

     0   :  { %s321_s14 = smov 0   ;;  %s341_s0 = inlined_call_operand.vmem [shape: f32[96,32], index: 0, kind: input, shape index: {}]   ;;  %s342_s1 = inlined_call_operand.vmem [shape: f32[1,32], index: 1, kind: input, shape index: {}]   ;;  %s343_s2 = inlined_call_operand.<no memory space> [shape: f32[1], index: 2, kind: input, shape index: {}]   ;;  %s344_s3 = inlined_call_operand.vmem [shape: f32[96,1], index: 3, kind: output, shape index: {}]  }
   0x1   :  { %8 = sst [smem:[#allocation2]] %s343_s2 }
   0x2 LB: > { %s270_s15 = sadd.s32 4294967295, %s296_s14   ;;  %p274_p0 = scmp.ge.s32.totalorder %s296_s14, 1  ;;  %s296_s14 = sphi %s321_s14, %s14_s14  }
   0x3   : > { %p139_p1 = scmp.lt.s32.totalorder %s296_s14, 4 }
   0x5   : > { %p140_p2 = pnand %p274_p0, %p139_p1 }
   0x6   : > { %s275_s16 = sshll.u32 (!%p140_p2), %s270_s15, 2  ;;  %s203_s22 = sld [smem:[#allocation2]] (!%p140_p2) }
   0x7   : > { %143 = sbr.rel (%p140_p2) target bundleno = 164 (0xa4), region = 32  ;;  %p164_p3 = scmp.lt.s32.totalorder (!%p140_p2), %s275_s16, 11 }
   0xc   : > { %s346_s16 = smov (!%p164_p3, %s275_s16), 11  ;;  %v279_v0 = vld [vmem:[%s342_s1] ss:$0 sm:$0xff]  ;;  %vm190_vm0 = vcmask 261120   ;;  %v204_v13 = vstv %s203_s22  ;;  %vm209_vm1 = vcmask 7168  }
   0xd   : > { %s276_s17 = sshll.u32 %s346_s16, 3 }
   0xe   : > { %s167_s21 = scalar_lea.vmem %s341_s0, %s276_s17  ;;  %s173_s25 = scalar_lea.vmem %s344_s3, %s276_s17 }
   0xf   : > { %v177_v1 = vld [vmem:[%s167_s21 + $0x10] sm:$0xff]  ;;  %v175_v2 = vld [vmem:[%s167_s21] sm:$0xff]  ;;  %v178_v3 = vld [vmem:[%s167_s21 + $0x18] sm:$0xff] }
  0x10   : > { %v188_v4 = vmul.f32 %v279_v0, %v177_v1  ;;  %v186_v5 = vmul.f32 %v279_v0, %v175_v2  ;;  %v189_v6 = vmul.f32 %v279_v0, %v178_v3  ;;  %v176_v7 = vld [vmem:[%s167_s21 + $0x8] sm:$0xff] }
  0x11   : > { %v187_v8 = vmul.f32 %v279_v0, %v176_v7 }
  0x12   : > { %v197_v9 = vsel %vm190_vm0, %v188_v4, 0.0  ;;  %v191_v10 = vsel %vm190_vm0, %v186_v5, 0.0  ;;  %v200_v11 = vsel %vm190_vm0, %v189_v6, 0.0 }
  0x13   : > { %198 = vadd.xlane.f32.xlu1 %v197_v9  ;;  %192 = vadd.xlane.f32.xlu0 %v191_v10  ;;  %v194_v12 = vsel %vm190_vm0, %v187_v8, 0.0 }
  0x17   : > { %201 = vadd.xlane.f32.xlu1 %v200_v11  ;;  %195 = vadd.xlane.f32.xlu0 %v194_v12 }
  0x9c   : > { %v199_v14 = vpop.xlane.xlu1 %198  ;;  %v193_v15 = vpop.xlane.xlu0 %192 }
  0x9d   : > { %v207_v16 = vadd.f32 %v204_v13, %v199_v14  ;;  %v205_v17 = vadd.f32 %v204_v13, %v193_v15 }
  0x9f   : > { %212 = vst.msk [vmem:[%s173_s25 + $0x10] sm:$0xff] %vm209_vm1, %v207_v16  ;;  %210 = vst.msk [vmem:[%s173_s25] sm:$0xff] %vm209_vm1, %v205_v17 }
  0xa0   : > { %v202_v18 = vpop.xlane.xlu1 %201  ;;  %v196_v19 = vpop.xlane.xlu0 %195 }
  0xa1   : > { %v208_v20 = vadd.f32 %v204_v13, %v202_v18  ;;  %v206_v21 = vadd.f32 %v204_v13, %v196_v19 }
  0xa3   : > { %213 = vst.msk [vmem:[%s173_s25 + $0x18] sm:$0xff] %vm209_vm1, %v208_v20  ;;  %211 = vst.msk [vmem:[%s173_s25 + $0x8] sm:$0xff] %vm209_vm1, %v206_v21 }
  0xa4 PF: > { %s14_s14 = sadd.s32 1, %s296_s14  }
  0xa5   : > { %p11_p4 = scmp.ge.s32.totalorder %s14_s14, 5  }
  0xa7   :  { %13 = sbr.rel (!%p11_p4) target bundleno = 2 (0x2), region = 62 }

</bundles_post_ra>
